<compile_context>
chip_gen: v7x
topology: tpu7x:2x2x1
jax: 0.10.0
libtpu: 0.0.40
codegen_flags: <defaults>
</compile_context>

<pallas_src>
import jax
import jax.numpy as jnp
from jax.experimental import pallas as pl
from jax.experimental.pallas import tpu as pltpu


# Safe scoped-VMEM budget on v5e/v6e (128 MiB) and v7x (64 MiB physical).
VMEM_LIMIT = 32 * 1024 * 1024


# ----------------------------------------------------------------------------
# Tiling / padding helpers
# ----------------------------------------------------------------------------

def _round_up(x, m):
    return ((x + m - 1) // m) * m


# Row-tile candidates: multiples of 8, including 7-friendly sizes (448, 392,
# 336) so EfficientNet spatial dims (49 * 2^k factors) get large tiles.
_TILE_CANDIDATES = (512, 448, 392, 384, 336, 320, 256, 224, 192, 160, 128)


def _pick_row_tile(m, target=512):
    """Largest nice divisor of m (<= target); full m if m <= target; else 0."""
    if m <= target:
        return m
    for t in _TILE_CANDIDATES:
        if t <= target and m % t == 0:
            return t
    return 0


def _pick_row_tile_nodiv_ok(m, target=512):
    """Like _pick_row_tile but always returns a valid divisor (never 0)."""
    t = _pick_row_tile(m, target)
    if t:
        return t
    for t in range(target, 7, -8):
        if m % t == 0:
            return t
    return m


def _pad_c(c):
    """Pad a channel count up to a multiple of 128 (lane width)."""
    return _round_up(max(c, 128), 128)


def _pad_last(a, n):
    pad = n - a.shape[-1]
    if pad == 0:
        return a
    width = [(0, 0)] * (a.ndim - 1) + [(0, pad)]
    return jnp.pad(a, width)


def _pad_axis(a, axis, n):
    pad = n - a.shape[axis]
    if pad == 0:
        return a
    width = [(0, 0)] * a.ndim
    width[axis] = (0, pad)
    return jnp.pad(a, width)


def _silu_f32(y):
    """SiLU on f32 with the reciprocal on the EUP slot."""
    return y * pl.reciprocal(1.0 + jnp.exp(-y), approx=True)


# ----------------------------------------------------------------------------
# Pallas kernels
# ----------------------------------------------------------------------------

def _matmul_kernel_factory(act):
    """y = act(x @ w + shift); bf16 MXU operands, f32 accumulate/epilogue."""
    def kernel(x_ref, w_ref, shift_ref, o_ref):
        y = jnp.dot(x_ref[...], w_ref[...], preferred_element_type=jnp.float32)
        y = y + shift_ref[...]
        if act == "silu":
            y = _silu_f32(y)
        o_ref[...] = y.astype(o_ref.dtype)
    return kernel


def _gate_project_kernel_factory(with_res):
    """y = (x * gate) @ w + shift [+ residual]  (SE gate fused into project)."""
    def kernel(*refs):
        if with_res:
            x_ref, g_ref, w_ref, shift_ref, res_ref, o_ref = refs
        else:
            x_ref, g_ref, w_ref, shift_ref, o_ref = refs
        xg = x_ref[0] * g_ref[0]                                   # bf16 (tm,K)*(1,K)
        y = jnp.dot(xg, w_ref[...], preferred_element_type=jnp.float32)
        y = y + shift_ref[...]
        if with_res:
            y = y + res_ref[0].astype(jnp.float32)
        o_ref[0] = y.astype(o_ref.dtype)
    return kernel


def _dw_s1_kernel_factory(k, Ho, Wo, inv_hw):
    """Stride-1 depthwise conv via in-VMEM shifted windows (no im2col) + BN
    shift + SiLU, with the SE global average pool fused in.  One image per
    grid step; taps accumulate in bf16, epilogue in f32."""
    def kernel(x_ref, w_ref, shift_ref, y_ref, pool_ref):
        acc = None
        for ki in range(k):
            for kj in range(k):
                tap = x_ref[0, ki:ki + Ho, kj:kj + Wo, :]          # [Ho,Wo,C] bf16
                wt = w_ref[ki * k + kj]                            # [1,1,C]  bf16
                term = tap * wt
                acc = term if acc is None else acc + term
        y = acc.astype(jnp.float32) + shift_ref[...]               # [Ho,Wo,C] f32
        y = _silu_f32(y)
        y_ref[0] = y.astype(y_ref.dtype)
        s = jnp.sum(y, axis=1, keepdims=True)                      # [Ho,1,C]
        s = jnp.sum(s, axis=0, keepdims=True)                      # [1,1,C]
        pool_ref[...] = s * inv_hw
    return kernel


def _dw_pool_kernel_factory(taps, inv_hw):
    """Stride-2 depthwise tap MAC (tap-major im2col patches) + BN shift + SiLU,
    with the SE global-average-pool fused as an accumulator epilogue over the
    row-tile axis.  Tap MACs in bf16."""
    def kernel(p_ref, w_ref, shift_ref, y_ref, pool_ref):
        w = w_ref[...]                                             # [T, C] bf16
        acc = p_ref[0, 0] * w[0:1, :]
        for t in range(1, taps):                                   # static unrolled taps
            acc = acc + p_ref[0, t] * w[t:t + 1, :]
        y = acc.astype(jnp.float32) + shift_ref[...]
        y = _silu_f32(y)
        y_ref[0] = y.astype(y_ref.dtype)

        @pl.when(pl.program_id(1) == 0)
        def _():
            pool_ref[...] = jnp.zeros_like(pool_ref)

        pool_ref[0] = pool_ref[0] + jnp.sum(y, axis=0, keepdims=True) * inv_hw
    return kernel


def _head_pool_kernel_factory(inv_hw):
    """conv_head 1x1 + folded BN + SiLU + global average pool, fused.  The
    pooled [1, N] row is the only HBM output (head activation never stored)."""
    def kernel(x_ref, w_ref, shift_ref, o_ref):
        @pl.when(pl.program_id(1) == 0)
        def _():
            o_ref[...] = jnp.zeros_like(o_ref)
        y = jnp.dot(x_ref[0], w_ref[...], preferred_element_type=jnp.float32)
        y = y + shift_ref[...]
        y = _silu_f32(y)
        o_ref[0] = o_ref[0] + jnp.sum(y, axis=0, keepdims=True) * inv_hw
    return kernel


# ----------------------------------------------------------------------------
# Pallas call wrappers
# ----------------------------------------------------------------------------

def matmul_fused(x, w, shift, act="none", out_dtype=jnp.bfloat16):
    """y = act(x @ w + shift); rows tiled, weight resident across the grid."""
    M, K = x.shape
    Kw, N = w.shape
    assert K == Kw
    tm = _pick_row_tile(M, 512)
    Mp = M
    if tm == 0:                       # no nice divisor: pad rows, slice after
        tm = 512
        Mp = _round_up(M, tm)
        x = jnp.pad(x, ((0, Mp - M), (0, 0)))
    grid = (Mp // tm,)
    shift2 = jnp.asarray(shift, jnp.float32).reshape(1, N)
    y = pl.pallas_call(
        _matmul_kernel_factory(act),
        out_shape=jax.ShapeDtypeStruct((Mp, N), out_dtype),
        grid=grid,
        in_specs=[
            pl.BlockSpec((tm, K), lambda i: (i, 0)),
            pl.BlockSpec((K, N), lambda i: (0, 0)),     # weight stays resident
            pl.BlockSpec((1, N), lambda i: (0, 0)),
        ],
        out_specs=pl.BlockSpec((tm, N), lambda i: (i, 0)),
        compiler_params=pltpu.CompilerParams(
            dimension_semantics=("parallel",),
            vmem_limit_bytes=VMEM_LIMIT),
    )(x.astype(jnp.bfloat16), w.astype(jnp.bfloat16), shift2)
    return y[:M] if Mp != M else y


def gate_project(x3, gate, w, shift, residual=None):
    """SE-gate + 1x1 project conv + BN shift [+ residual], batched over B."""
    B, HW, K = x3.shape
    Kw, N = w.shape
    assert K == Kw
    tm = _pick_row_tile_nodiv_ok(HW, 512)
    grid = (B, HW // tm)
    shift2 = jnp.asarray(shift, jnp.float32).reshape(1, N)
    in_specs = [
        pl.BlockSpec((1, tm, K), lambda b, i: (b, i, 0)),
        pl.BlockSpec((1, 1, K), lambda b, i: (b, 0, 0)),
        pl.BlockSpec((K, N), lambda b, i: (0, 0)),      # weight stays resident
        pl.BlockSpec((1, N), lambda b, i: (0, 0)),
    ]
    args = [x3.astype(jnp.bfloat16),
            gate.reshape(B, 1, K).astype(jnp.bfloat16),
            w.astype(jnp.bfloat16), shift2]
    if residual is not None:
        in_specs.append(pl.BlockSpec((1, tm, N), lambda b, i: (b, i, 0)))
        args.append(residual.astype(jnp.bfloat16))
    return pl.pallas_call(
        _gate_project_kernel_factory(residual is not None),
        out_shape=jax.ShapeDtypeStruct((B, HW, N), jnp.bfloat16),
        grid=grid,
        in_specs=in_specs,
        out_specs=pl.BlockSpec((1, tm, N), lambda b, i: (b, i, 0)),
        compiler_params=pltpu.CompilerParams(
            dimension_semantics=("parallel", "parallel"),
            vmem_limit_bytes=VMEM_LIMIT),
    )(*args)


def dwconv_s1_pool(x, w, shift, k):
    """Stride-1 depthwise conv + BN shift + SiLU + fused SE pool, no im2col.

    Returns (y3 [B, H*W, C] bf16, pooled [B, C] f32, Ho, Wo)."""
    B, H, W, C = x.shape
    pad = k // 2
    Ho, Wo = H, W
    xp = jnp.pad(x.astype(jnp.bfloat16),
                 ((0, 0), (pad, pad), (pad, pad), (0, 0)))
    Hp, Wp = H + 2 * pad, W + 2 * pad
    w4 = w.reshape(k * k, 1, 1, C).astype(jnp.bfloat16)
    shift3 = jnp.asarray(shift, jnp.float32).reshape(1, 1, C)
    y, pooled = pl.pallas_call(
        _dw_s1_kernel_factory(k, Ho, Wo, 1.0 / (Ho * Wo)),
        out_shape=(jax.ShapeDtypeStruct((B, Ho, Wo, C), jnp.bfloat16),
                   jax.ShapeDtypeStruct((B, 1, C), jnp.float32)),
        grid=(B,),
        in_specs=[pl.BlockSpec((1, Hp, Wp, C), lambda b: (b, 0, 0, 0)),
                  pl.BlockSpec((k * k, 1, 1, C), lambda b: (0, 0, 0, 0)),
                  pl.BlockSpec((1, 1, C), lambda b: (0, 0, 0))],
        out_specs=(pl.BlockSpec((1, Ho, Wo, C), lambda b: (b, 0, 0, 0)),
                   pl.BlockSpec((1, 1, C), lambda b: (b, 0, 0))),
        compiler_params=pltpu.CompilerParams(
            dimension_semantics=("parallel",),
            vmem_limit_bytes=VMEM_LIMIT),
    )(xp, w4, shift3)
    return y.reshape(B, Ho * Wo, C), pooled.reshape(B, C), Ho, Wo


def dwconv_s2_pool(x, w, shift, k, stride):
    """Strided depthwise conv via tap-major im2col (built directly, no extra
    transpose pass) + BN shift + SiLU + fused SE pool."""
    B, H, W, C = x.shape
    pad = k // 2
    taps = k * k
    xp = jnp.pad(x.astype(jnp.bfloat16),
                 ((0, 0), (pad, pad), (pad, pad), (0, 0)))
    Ho = (H + 2 * pad - k) // stride + 1
    Wo = (W + 2 * pad - k) // stride + 1
    HW = Ho * Wo
    tap_list = []
    for i in range(k):
        for j in range(k):
            tap_list.append(
                xp[:, i:i + stride * Ho:stride, j:j + stride * Wo:stride, :]
                .reshape(B, HW, C))
    p = jnp.stack(tap_list, axis=1)                    # [B, T, HW, C] tap-major
    tm = _pick_row_tile_nodiv_ok(HW, 512)
    grid = (B, HW // tm)
    w2 = w.reshape(taps, C).astype(jnp.bfloat16)
    shift2 = jnp.asarray(shift, jnp.float32).reshape(1, C)
    y3, pooled = pl.pallas_call(
        _dw_pool_kernel_factory(taps, 1.0 / HW),
        out_shape=(jax.ShapeDtypeStruct((B, HW, C), jnp.bfloat16),
                   jax.ShapeDtypeStruct((B, 1, C), jnp.float32)),
        grid=grid,
        in_specs=[pl.BlockSpec((1, taps, tm, C), lambda b, i: (b, 0, i, 0)),
                  pl.BlockSpec((taps, C), lambda b, i: (0, 0)),
                  pl.BlockSpec((1, C), lambda b, i: (0, 0))],
        out_specs=(pl.BlockSpec((1, tm, C), lambda b, i: (b, i, 0)),
                   pl.BlockSpec((1, 1, C), lambda b, i: (b, 0, 0))),
        compiler_params=pltpu.CompilerParams(
            dimension_semantics=("parallel", "arbitrary"),
            vmem_limit_bytes=VMEM_LIMIT),
    )(p, w2, shift2)
    return y3, pooled.reshape(B, C), Ho, Wo


def head_pool(x3, w, shift):
    """Fused conv_head 1x1 + folded BN + SiLU + global average pool -> [B, N]."""
    B, HW, K = x3.shape
    Kw, N = w.shape
    assert K == Kw
    tm = _pick_row_tile_nodiv_ok(HW, 512)
    grid = (B, HW // tm)
    shift2 = jnp.asarray(shift, jnp.float32).reshape(1, N)
    out = pl.pallas_call(
        _head_pool_kernel_factory(1.0 / HW),
        out_shape=jax.ShapeDtypeStruct((B, 1, N), jnp.float32),
        grid=grid,
        in_specs=[pl.BlockSpec((1, tm, K), lambda b, i: (b, i, 0)),
                  pl.BlockSpec((K, N), lambda b, i: (0, 0)),
                  pl.BlockSpec((1, N), lambda b, i: (0, 0))],
        out_specs=pl.BlockSpec((1, 1, N), lambda b, i: (b, 0, 0)),
        compiler_params=pltpu.CompilerParams(
            dimension_semantics=("parallel", "arbitrary"),
            vmem_limit_bytes=VMEM_LIMIT),
    )(x3.astype(jnp.bfloat16), w.astype(jnp.bfloat16), shift2)
    return out.reshape(B, N)


# ----------------------------------------------------------------------------
# JAX glue: stem im2col + SE FC layers
# ----------------------------------------------------------------------------

def extract_patches(x, k, stride, pad):
    """x: [B, H, W, C] -> patches [B, Ho, Wo, k*k, C] (same dtype as x)."""
    B, H, W, C = x.shape
    xp = jnp.pad(x, ((0, 0), (pad, pad), (pad, pad), (0, 0)))
    Ho = (H + 2 * pad - k) // stride + 1
    Wo = (W + 2 * pad - k) // stride + 1
    taps = []
    for i in range(k):
        for j in range(k):
            taps.append(xp[:, i:i + stride * Ho:stride, j:j + stride * Wo:stride, :])
    p = jnp.stack(taps, axis=3)
    return p, Ho, Wo


def conv2d_bn_silu(x, w, shift, stride, pad):
    """Standard conv (BN scale folded into w) via bf16 im2col + tiled matmul."""
    B, H, W, Cin = x.shape
    k = w.shape[0]
    Cout = w.shape[-1]
    p, Ho, Wo = extract_patches(x, k, stride, pad)
    p2 = p.reshape(B * Ho * Wo, k * k * Cin)
    w2 = w.reshape(k * k * Cin, Cout)
    y = matmul_fused(p2, w2, shift, act="silu")
    return y.reshape(B, Ho, Wo, Cout)


def se_gate(pooled, w_red, b_red, w_exp, b_exp):
    """Tiny SE FC layers (M = batch) — far below MXU tile size, plain XLA."""
    r = pooled @ w_red + b_red
    r = r * jax.nn.sigmoid(r)          # SiLU
    g = r @ w_exp + b_exp
    return jax.nn.sigmoid(g)           # [B, C] gate in [0, 1]


# ----------------------------------------------------------------------------
# Model definition (EfficientNet-B0-like stages, eval-mode folded BatchNorm)
# ----------------------------------------------------------------------------

# (expand_ratio, kernel, stride, out_channels, repeats)
STAGES = [
    (1, 3, 1, 16, 1),
    (6, 3, 2, 24, 2),
    (6, 5, 2, 40, 1),
    (6, 3, 2, 80, 1),
    (6, 5, 1, 112, 1),
    (6, 5, 2, 192, 1),
    (6, 3, 1, 320, 1),
]
SE_RATIO = 0.25
HEAD_CH = 1280
BN_EPS = 1e-5


class KeyGen:
    def __init__(self, key):
        self.key = key

    def next(self):
        self.key, k = jax.random.split(self.key)
        return k


def bn_fold(kg, c):
    """Return (scale, shift) of an eval-mode BatchNorm; scale gets folded into w."""
    gamma = jax.random.uniform(kg.next(), (c,), jnp.float32, 0.5, 1.0)
    beta = 0.01 * jax.random.normal(kg.next(), (c,), jnp.float32)
    mean = 0.05 * jax.random.normal(kg.next(), (c,), jnp.float32)
    var = jax.random.uniform(kg.next(), (c,), jnp.float32, 0.8, 1.2)
    scale = gamma / jnp.sqrt(var + BN_EPS)
    shift = beta - mean * scale
    return scale, shift


def conv_w(kg, k, cin, cout):
    return jax.random.normal(kg.next(), (k, k, cin, cout), jnp.float32) / jnp.sqrt(k * k * cin)


def dw_w(kg, k, c):
    return jax.random.normal(kg.next(), (k, k, c), jnp.float32) / jnp.sqrt(k * k)


def pw_w(kg, cin, cout):
    return jax.random.normal(kg.next(), (cin, cout), jnp.float32) / jnp.sqrt(cin)


def se_params(kg, c_mid, c_in_block, c_mid_p):
    rd = max(1, int(c_in_block * SE_RATIO))
    w_red = pw_w(kg, c_mid, rd)
    b_red = 0.01 * jax.random.normal(kg.next(), (rd,), jnp.float32)
    w_exp = pw_w(kg, rd, c_mid)
    b_exp = 0.01 * jax.random.normal(kg.next(), (c_mid,), jnp.float32)
    # pad SE tensors on the c_mid side so they consume/produce padded channels
    w_red = _pad_axis(w_red, 0, c_mid_p)
    w_exp = _pad_last(w_exp, c_mid_p)
    b_exp = _pad_last(b_exp, c_mid_p)
    return (w_red, b_red, w_exp, b_exp)


def build_params(inp_channels, seed=42):
    """Weights with BN scale folded in and every channel dim zero-padded to a
    multiple of 128 (lane width).  Zero padding propagates exactly through
    SiLU / SE / residual, so logical-channel results are unchanged."""
    kg = KeyGen(jax.random.PRNGKey(seed))
    params = {}
    # conv_stem: Conv2d(inp_channels, 32, 3, 2, 1, bias=False) + bn1 (scale folded)
    w = conv_w(kg, 3, inp_channels, 32)
    sc, sh = bn_fold(kg, 32)
    c0p = _pad_c(32)
    params["stem_w"] = _pad_last(w * sc, c0p).astype(jnp.bfloat16)
    params["stem_shift"] = _pad_last(sh, c0p)
    blocks = []
    cin, cin_p = 32, c0p
    for (exp, k, stride, cout, reps) in STAGES:
        for r in range(reps):
            s = stride if r == 0 else 1
            blk = {}
            cmid = cin * exp
            if exp != 1:
                cmid_p = _pad_c(cmid)
                we = pw_w(kg, cin, cmid)
                sce, she = bn_fold(kg, cmid)
                we = _pad_axis(_pad_last(we * sce, cmid_p), 0, cin_p)
                blk["expand"] = (we.astype(jnp.bfloat16), _pad_last(she, cmid_p))
            else:
                cmid_p = cin_p
                blk["expand"] = None
            wd = dw_w(kg, k, cmid)
            scd, shd = bn_fold(kg, cmid)
            blk["dw"] = (_pad_last(wd * scd, cmid_p).astype(jnp.bfloat16),
                         _pad_last(shd, cmid_p))
            blk["se"] = se_params(kg, cmid, cin, cmid_p)
            cout_p = _pad_c(cout)
            wp = pw_w(kg, cmid, cout)
            scp, shp = bn_fold(kg, cout)
            wp = _pad_axis(_pad_last(wp * scp, cout_p), 0, cmid_p)
            blk["project"] = (wp.astype(jnp.bfloat16), _pad_last(shp, cout_p))
            blk["stride"] = s
            blk["kernel"] = k
            blk["use_res"] = (s == 1 and cin == cout)
            blocks.append(blk)
            cin, cin_p = cout, cout_p
    params["blocks"] = blocks
    # conv_head (1x1, no bias) + bn2 (scale folded); 1280 is already 128-aligned
    wh = pw_w(kg, cin, HEAD_CH)
    sch, shh = bn_fold(kg, HEAD_CH)
    params["head_w"] = _pad_axis(wh * sch, 0, cin_p).astype(jnp.bfloat16)
    params["head_shift"] = shh
    return params


def mbconv(x, blk):
    B, H, W, Cin = x.shape
    shortcut = x
    # expand (1x1 conv + folded-BN + SiLU) — tiled Pallas matmul
    if blk["expand"] is not None:
        we, she = blk["expand"]
        x = matmul_fused(x.reshape(B * H * W, Cin), we, she, act="silu")
        x = x.reshape(B, H, W, we.shape[1])
    # depthwise conv + folded-BN + SiLU, with SE global pool fused in
    wd, shd = blk["dw"]
    k = blk["kernel"]
    if blk["stride"] == 1:
        x3, pooled, Ho, Wo = dwconv_s1_pool(x, wd, shd, k)
    else:
        x3, pooled, Ho, Wo = dwconv_s2_pool(x, wd, shd, k, blk["stride"])
    # SE FC layers (tiny) in plain XLA, then gate + project + residual fused
    gate = se_gate(pooled, *blk["se"])                              # [B, Cmid_p]
    wp, shp = blk["project"]
    res3 = shortcut.reshape(B, H * W, Cin) if blk["use_res"] else None
    y3 = gate_project(x3, gate, wp, shp, residual=res3)             # [B, Ho*Wo, Cout_p]
    return y3.reshape(B, Ho, Wo, wp.shape[1])


def efficientnet_forward(x_nchw, params):
    """Matches EfficientNet.forward: stem -> bn1 -> act1 -> blocks -> conv_head
    -> bn2 -> act2 -> global_pool -> flatten(1)."""
    x = jnp.transpose(x_nchw, (0, 2, 3, 1)).astype(jnp.bfloat16)    # NCHW -> NHWC
    x = conv2d_bn_silu(x, params["stem_w"], params["stem_shift"], stride=2, pad=1)
    for blk in params["blocks"]:
        x = mbconv(x, blk)
    B, H, W, C = x.shape
    # conv_head + bn2 + act2 + global pool fused; output is exactly [B, 1280]
    feat = head_pool(x.reshape(B, H * W, C), params["head_w"], params["head_shift"])
    return feat                                                     # == flatten(1)


if __name__ == "__main__":
    key = jax.random.PRNGKey(0)
    # cfg.MODEL.INP_CHANNEL = 4 (!= 3), so conv_stem takes 4 input channels.
    x = jax.random.normal(key, (2, 4, 16, 16), jnp.float32)         # NCHW
    params = build_params(inp_channels=4)
    out = efficientnet_forward(x, params)
    out = jax.block_until_ready(out)
    assert out.shape == (2, HEAD_CH), out.shape
    assert bool(jnp.all(jnp.isfinite(out)))
    print("KERNEL_OK")
</pallas_src>

<mosaic_0001>
module attributes {stable_mosaic.version = 11 : i64} {
  func.func @kernel(%arg0: i32, %arg1: memref<128x36xbf16, #tpu.memory_space<vmem>>, %arg2: memref<36x128xbf16, #tpu.memory_space<vmem>>, %arg3: memref<1x128xf32, #tpu.memory_space<vmem>>, %arg4: memref<128x128xbf16, #tpu.memory_space<vmem>>) attributes {dimension_semantics = [#tpu.dimension_semantics<parallel>], iteration_bounds = array<i64: 1>, scalar_prefetch = 0 : i64, scratch_operands = 0 : i64, tpu.core_type = #tpu.core_type<tc>, window_params = [{transform_indices = @transform_0, window_bounds = array<i64: 128, 36>}, {pipeline_mode = #tpu.pipeline_mode<synchronous>, transform_indices = @transform_1, window_bounds = array<i64: 36, 128>}, {pipeline_mode = #tpu.pipeline_mode<synchronous>, transform_indices = @transform_2, window_bounds = array<i64: 1, 128>}, {transform_indices = @transform_3, window_bounds = array<i64: 128, 128>}]} {
    %c0 = arith.constant 0 : index
    %c0_0 = arith.constant 0 : index
    %0 = vector.load %arg1[%c0, %c0_0] : memref<128x36xbf16, #tpu.memory_space<vmem>>, vector<128x36xbf16>
    %c0_1 = arith.constant 0 : index
    %c0_2 = arith.constant 0 : index
    %1 = vector.load %arg2[%c0_1, %c0_2] : memref<36x128xbf16, #tpu.memory_space<vmem>>, vector<36x128xbf16>
    %cst = arith.constant dense<0.000000e+00> : vector<128x128xf32>
    %2 = tpu.matmul %0, %1, %cst {dimension_numbers = #tpu.dot_dimension_numbers<[1], [0], [0], [1], [0, 0, 1, 1], [], []>} : vector<128x36xbf16>, vector<36x128xbf16>, vector<128x128xf32> -> vector<128x128xf32>
    %c0_3 = arith.constant 0 : index
    %c0_4 = arith.constant 0 : index
    %3 = vector.load %arg3[%c0_3, %c0_4] : memref<1x128xf32, #tpu.memory_space<vmem>>, vector<1x128xf32>
    %4 = vector.broadcast %3 : vector<1x128xf32> to vector<128x128xf32>
    %5 = arith.addf %2, %4 : vector<128x128xf32>
    %cst_5 = arith.constant 0.000000e+00 : f32
    %6 = vector.broadcast %cst_5 : f32 to vector<128x128xf32>
    %7 = arith.subf %6, %5 : vector<128x128xf32>
    %8 = math.exp %7 : vector<128x128xf32>
    %cst_6 = arith.constant 1.000000e+00 : f32
    %9 = vector.broadcast %cst_6 : f32 to vector<128x128xf32>
    %10 = arith.addf %9, %8 : vector<128x128xf32>
    %11 = tpu.reciprocal %10 {approx = true} : vector<128x128xf32> -> vector<128x128xf32>
    %12 = arith.mulf %5, %11 : vector<128x128xf32>
    %13 = arith.truncf %12 : vector<128x128xf32> to vector<128x128xbf16>
    %c0_7 = arith.constant 0 : index
    %c0_8 = arith.constant 0 : index
    %14 = vector.load %arg4[%c0_7, %c0_8] : memref<128x128xbf16, #tpu.memory_space<vmem>>, vector<128x128xbf16>
    tpu.vector_store %arg4[%c0_7, %c0_8], %13 {strides = array<i32>} : memref<128x128xbf16, #tpu.memory_space<vmem>>, vector<128x128xbf16>,
    return
  }
  func.func @transform_0(%arg0: i32) -> (i32, i32) {
    %c0_i32 = arith.constant 0 : i32
    %c0_i32_0 = arith.constant 0 : i32
    return %arg0, %c0_i32 : i32, i32
  }
  func.func @transform_1(%arg0: i32) -> (i32, i32) {
    %c0_i32 = arith.constant 0 : i32
    %c0_i32_0 = arith.constant 0 : i32
    %c0_i32_1 = arith.constant 0 : i32
    return %c0_i32, %c0_i32_0 : i32, i32
  }
  func.func @transform_2(%arg0: i32) -> (i32, i32) {
    %c0_i32 = arith.constant 0 : i32
    %c0_i32_0 = arith.constant 0 : i32
    %c0_i32_1 = arith.constant 0 : i32
    return %c0_i32, %c0_i32_0 : i32, i32
  }
  func.func @transform_3(%arg0: i32) -> (i32, i32) {
    %c0_i32 = arith.constant 0 : i32
    %c0_i32_0 = arith.constant 0 : i32
    return %arg0, %c0_i32 : i32, i32
  }
}

</mosaic_0001>

<bundles_post_ra>
// kernel: tpu_custom_call.1
= control target key start
LH: loop header
LB: loop body
LE: loop exit
PB: predicated region body
PF: predicated region fallthrough
CT: control target
= control target key end

     0   :  { %vm99_vm0 = vcmask 293888   ;;  %vm124_vm1 = vcmask 1041408   ;;  %s820_s0 = inlined_call_operand.vmem [shape: bf16[128,36], index: 0, kind: input, shape index: {}]   ;;  %s821_s1 = inlined_call_operand.vmem [shape: bf16[36,128], index: 1, kind: input, shape index: {}]   ;;  %s822_s2 = inlined_call_operand.vmem [shape: f32[1,128], index: 2, kind: input, shape index: {}]   ;;  %s823_s3 = inlined_call_operand.hbm [shape: bf16[128,128], index: 3, kind: output, shape index: {}]  }
   0x1   :  { %v560_v0 = vld [vmem:[%s821_s1] sm:$0xff]   ;;  %v561_v1 = vld [vmem:[%s821_s1 + $0x8] sm:$0xff]   ;;  %v562_v2 = vld [vmem:[%s821_s1 + $0x10] ss:$0 sps:$4 sm:$0x33]  }
   0x2   :  { %527 = vmatprep.subr.bf16.mxu0 %v560_v0  ;;  %549 = vmatprep.subr.bf16.mxu1 %v560_v0  ;;  %v563_v3 = vld [vmem:[%s820_s0] sm:$0xff]   ;;  %v126_v5 = vsel %vm124_vm1, %v562_v2, 0  ;;  %v565_v6 = vld [vmem:[%s820_s0 + $0x8] sm:$0xff]  }
   0x3   :  { %528 = vmatpush3.bf16.msra.mxu0 %v560_v0  ;;  %552 = vmatpush3.bf16.msra.mxu1 %v560_v0  ;;  %v564_v4 = vld [vmem:[%s820_s0 + $0x20] sm:$0xff]   ;;  %v566_v7 = vld [vmem:[%s820_s0 + $0x28] sm:$0xff]  }
   0x4   :  { %529 = vmatprep.subr.bf16.mxu0 %v561_v1  ;;  %550 = vmatprep.subr.bf16.mxu1 %v561_v1 }
   0x5   :  { %533 = vmatprep.mubr.msk.bf16.mxu0 %vm99_vm0, %v563_v3  ;;  %541 = vmatprep.mubr.msk.bf16.mxu1 %vm99_vm0, %v564_v4 }
   0x7   :  { %530 = vmatpush3.bf16.msra.mxu0 %v561_v1  ;;  %553 = vmatpush3.bf16.msra.mxu1 %v561_v1 }
   0x8   :  { %555 = vmatprep.subr.msk.bf16.mxu0 %vm124_vm1, %v562_v2  ;;  %556 = vmatprep.subr.msk.bf16.mxu1 %vm124_vm1, %v562_v2 }
   0x9   :  { %8 = vsyncpa [#allocation3], 0  ;;  %v567_v8 = vld [vmem:[%s820_s0 + $0x10] sm:$0xff]   ;;  %v569_v10 = vld [vmem:[%s820_s0 + $0x18] sm:$0xff]  }
   0xa   :  { %v568_v9 = vld [vmem:[%s820_s0 + $0x30] sm:$0xff]   ;;  %v570_v11 = vld [vmem:[%s820_s0 + $0x38] sm:$0xff]   ;;  %v726_v12 = vld [vmem:[%s822_s2] ss:$0 sm:$0xff]  ;;  %s659_s0 = smov [#allocation2]  }
   0xb   :  { %532 = vmatpush3.bf16.msra.mxu0 %v126_v5  ;;  %554 = vmatpush3.bf16.msra.mxu1 %v126_v5  ;;  %s406_s2 = sshll.u32 %s659_s0, 4  ;;  %s407_s2 = int_to_ptr.vmem [resolvable:$true] %s406_s2 }
   0xc   :  { %s635_s8 = scalar_lea.vmem %s407_s2, 1024  ;;  %p640_p1 = scmp.lt.s32.totalorder %s407_s2, %s407_s2 }
   0xd   :  { %p636_p0 = scmp.ne.s32.totalorder %s407_s2, %s635_s8  ;;  %p641_p2 = scmp.lt.s32.totalorder %s635_s8, %s635_s8 }
   0xe   :  { %534 = vmatmul.mubr.msk.bf16.vlgmr.msra.gmra.mrb[0].mxu0 %vm99_vm0, %v565_v6  ;;  %542 = vmatmul.mubr.msk.bf16.vlgmr.msra.gmra.mrb[0].mxu1 %vm99_vm0, %v566_v7 }
   0xf   :  { %537 = vmatprep.mubr.msk.bf16.mxu0 %vm99_vm0, %v567_v8  ;;  %545 = vmatprep.mubr.msk.bf16.mxu1 %vm99_vm0, %v568_v9  ;;  %p642_p3 = por %p641_p2, %p640_p1 }
  0x11   :  { %p643_p4 = pnand %p642_p3, %p636_p0 }
  0x16   :  { %538 = vmatmul.mubr.msk.bf16.gmra.mrb[4].mxu0 %vm99_vm0, %v569_v10  ;;  %546 = vmatmul.mubr.msk.bf16.gmra.mrb[4].mxu1 %vm99_vm0, %v570_v11 }
  0xe1   :  { %v535_v13 = vpop.f32.mrb[0].mxu0  ;;  %v543_v14 = vpop.f32.mrb[0].mxu1 }
  0xe2   :  { %v729_v15 = vadd.f32 %v535_v13, %v726_v12  ;;  %v732_v16 = vadd.f32 %v543_v14, %v726_v12  ;;  %v162_v17 = vpop.f32.mrb[1].mxu0  ;;  %v194_v18 = vpop.f32.mrb[1].mxu1 }
  0xe3   :  { %v735_v19 = vadd.f32 %v726_v12, %v162_v17  ;;  %v738_v20 = vadd.f32 %v726_v12, %v194_v18  ;;  %v536_v21 = vpop.f32.mrb[2].mxu0  ;;  %v544_v22 = vpop.f32.mrb[2].mxu1 }
  0xe4   :  { %v227_v23 = vsub.f32 0.0, %v729_v15  ;;  %v235_v24 = vsub.f32 0.0, %v732_v16  ;;  %v743_v25 = vadd.f32 %v536_v21, %v726_v12  ;;  %v746_v26 = vadd.f32 %v544_v22, %v726_v12  ;;  %v165_v27 = vpop.f32.mrb[3].mxu0  ;;  %v197_v28 = vpop.f32.mrb[3].mxu1 }
  0xe5   :  { %v225_v29 = vsub.f32 0.0, %v735_v19  ;;  %v233_v30 = vsub.f32 0.0, %v738_v20  ;;  %v751_v31 = vadd.f32 %v726_v12, %v165_v27  ;;  %v754_v32 = vadd.f32 %v726_v12, %v197_v28 }
  0xe6   :  { %v245_v33 = vmul.f32 1.442695, %v227_v23  ;;  %v261_v34 = vmul.f32 1.442695, %v235_v24  ;;  %v228_v35 = vsub.f32 0.0, %v743_v25  ;;  %v236_v36 = vsub.f32 0.0, %v746_v26 }
  0xe7   :  { %v241_v37 = vmul.f32 1.442695, %v225_v29  ;;  %v257_v38 = vmul.f32 1.442695, %v233_v30  ;;  %v226_v39 = vsub.f32 0.0, %v751_v31  ;;  %v234_v40 = vsub.f32 0.0, %v754_v32 }
  0xe8   :  { %571 = vpow2.f32 %v245_v33  ;;  %v247_v41 = vmul.f32 1.442695, %v228_v35  ;;  %v263_v42 = vmul.f32 1.442695, %v236_v36 }
  0xe9   :  { %573 = vpow2.f32 %v261_v34  ;;  %v539_v43 = vpop.f32.mrb[4].mxu0  ;;  %v547_v44 = vpop.f32.mrb[4].mxu1  ;;  %v243_v45 = vmul.f32 1.442695, %v226_v39  ;;  %v259_v50 = vmul.f32 1.442695, %v234_v40 }
  0xea   :  { %575 = vpow2.f32 %v241_v37  ;;  %v761_v46 = vadd.f32 %v539_v43, %v726_v12  ;;  %v764_v47 = vadd.f32 %v547_v44, %v726_v12  ;;  %v178_v48 = vpop.f32.mrb[5].mxu0  ;;  %v210_v49 = vpop.f32.mrb[5].mxu1 }
  0xeb   :  { %577 = vpow2.f32 %v257_v38  ;;  %v767_v51 = vadd.f32 %v726_v12, %v178_v48  ;;  %v540_v52 = vpop.f32.mrb[6].mxu0  ;;  %v548_v53 = vpop.f32.mrb[6].mxu1  ;;  %v777_v1 = vadd.f32 %v726_v12, %v210_v49 }
  0xec   :  { %579 = vpow2.f32 %v247_v41  ;;  %v231_v54 = vsub.f32 0.0, %v761_v46  ;;  %v239_v55 = vsub.f32 0.0, %v764_v47  ;;  %v772_v56 = vadd.f32 %v540_v52, %v726_v12  ;;  %v181_v57 = vpop.f32.mrb[7].mxu0  ;;  %v213_v58 = vpop.f32.mrb[7].mxu1 }
  0xed   :  { %581 = vpow2.f32 %v263_v42  ;;  %v229_v59 = vsub.f32 0.0, %v767_v51  ;;  %v237_v9 = vsub.f32 0.0, %v777_v1  ;;  %v781_v13 = vadd.f32 %v548_v53, %v726_v12 }
  0xee   :  { %583 = vpow2.f32 %v243_v45  ;;  %v253_v60 = vmul.f32 1.442695, %v231_v54  ;;  %v269_v61 = vmul.f32 1.442695, %v239_v55  ;;  %v232_v62 = vsub.f32 0.0, %v772_v56 }
  0xef   :  { %585 = vpow2.f32 %v259_v50  ;;  %v249_v63 = vmul.f32 1.442695, %v229_v59  ;;  %v784_v18 = vadd.f32 %v726_v12, %v181_v57  ;;  %v787_v23 = vadd.f32 %v726_v12, %v213_v58 }
  0xf0   :  { %587 = vpow2.f32 %v253_v60  ;;  %v255_v0 = vmul.f32 1.442695, %v232_v62  ;;  %v265_v28 = vmul.f32 1.442695, %v237_v9  ;;  %v240_v33 = vsub.f32 0.0, %v781_v13 }
  0xf1   :  { %589 = vpow2.f32 %v269_v61  ;;  %v230_v35 = vsub.f32 0.0, %v784_v18  ;;  %v238_v37 = vsub.f32 0.0, %v787_v23 }
  0xf2   :  { %v572_v2 = vpop.eup %571  ;;  %591 = vpow2.f32 %v249_v63  ;;  %v271_v39 = vmul.f32 1.442695, %v240_v33 }
  0xf3   :  { %v574_v3 = vpop.eup %573  ;;  %v275_v4 = vadd.f32 1.0, %v572_v2  ;;  %593 = vpow2.f32 %v255_v0  ;;  %v251_v42 = vmul.f32 1.442695, %v230_v35  ;;  %v267_v44 = vmul.f32 1.442695, %v238_v37 }
  0xf4   :  { %v576_v5 = vpop.eup %575  ;;  %v283_v6 = vadd.f32 1.0, %v574_v3 }
  0xf5   :  { %v578_v7 = vpop.eup %577  ;;  %595 = vrcp.f32 %v275_v4  ;;  %v273_v8 = vadd.f32 1.0, %v576_v5 }
  0xf6   :  { %v580_v10 = vpop.eup %579  ;;  %597 = vrcp.f32 %v283_v6  ;;  %v281_v11 = vadd.f32 1.0, %v578_v7 }
  0xf7   :  { %v582_v14 = vpop.eup %581  ;;  %599 = vrcp.f32 %v273_v8  ;;  %v276_v17 = vadd.f32 1.0, %v580_v10 }
  0xf8   :  { %v584_v21 = vpop.eup %583  ;;  %601 = vrcp.f32 %v281_v11  ;;  %v284_v22 = vadd.f32 1.0, %v582_v14 }
  0xf9   :  { %v586_v24 = vpop.eup %585  ;;  %603 = vrcp.f32 %v276_v17  ;;  %v274_v27 = vadd.f32 1.0, %v584_v21 }
  0xfa   :  { %v588_v29 = vpop.eup %587  ;;  %605 = vrcp.f32 %v284_v22  ;;  %v282_v30 = vadd.f32 1.0, %v586_v24 }
  0xfb   :  { %607 = vrcp.f32 %v274_v27  ;;  %v279_v34 = vadd.f32 1.0, %v588_v29  ;;  %v590_v36 = vpop.eup %589 }
  0xfc   :  { %609 = vrcp.f32 %v282_v30  ;;  %v592_v38 = vpop.eup %591  ;;  %v287_v2 = vadd.f32 1.0, %v590_v36 }
  0xfd   :  { %611 = vpow2.f32 %v265_v28  ;;  %v594_v12 = vpop.eup %593  ;;  %v277_v4 = vadd.f32 1.0, %v592_v38 }
  0xfe   :  { %613 = vrcp.f32 %v279_v34  ;;  %v280_v41 = vadd.f32 1.0, %v594_v12 }
  0xff   :  { %v596_v40 = vpop.eup %595 }
 0x100   :  { %v598_v43 = vpop.eup %597  ;;  %615 = vrcp.f32 %v280_v41  ;;  %v307_v52 = vmul.f32 %v596_v40, %v729_v15 }
 0x101   :  { %v600_v45 = vpop.eup %599  ;;  %617 = vpow2.f32 %v271_v39  ;;  %v315_v55 = vmul.f32 %v598_v43, %v732_v16 }
 0x102   :  { %v602_v48 = vpop.eup %601  ;;  %619 = vpow2.f32 %v251_v42  ;;  %v305_v59 = vmul.f32 %v600_v45, %v735_v19 }
 0x103   :  { %v604_v49 = vpop.eup %603  ;;  %621 = vpow2.f32 %v267_v44  ;;  %v313_v63 = vmul.f32 %v602_v48, %v738_v20 }
 0x104   :  { %v606_v50 = vpop.eup %605  ;;  %v308_v53 = vmul.f32 %v604_v49, %v743_v25  ;;  %623 = vrcp.f32 %v287_v2 }
 0x105   :  { %v608_v54 = vpop.eup %607  ;;  %v316_v57 = vmul.f32 %v606_v50, %v746_v26  ;;  %625 = vrcp.f32 %v277_v4 }
 0x106   :  { %v610_v58 = vpop.eup %609  ;;  %v477_v60 = vpack.c.bf16 %v308_v53, %v307_v52  ;;  %v306_v61 = vmul.f32 %v608_v54, %v751_v31 }
 0x107   :  { %v612_v62 = vpop.eup %611  ;;  %v497_v0 = vpack.c.bf16 %v316_v57, %v315_v55  ;;  %v314_v15 = vmul.f32 %v610_v58, %v754_v32 }
 0x108   :  { %509 = vst [vmem:[#allocation2 + $0x8] sm:$0xff] %v477_v60   ;;  %v472_v25 = vpack.c.bf16 %v306_v61, %v305_v59  ;;  %v614_v3 = vpop.eup %613  ;;  %v285_v26 = vadd.f32 1.0, %v612_v62 }
 0x109   :  { %513 = vst [vmem:[#allocation2 + $0x28] sm:$0xff] %v497_v0   ;;  %v492_v16 = vpack.c.bf16 %v314_v15, %v313_v63  ;;  %v311_v31 = vmul.f32 %v614_v3, %v761_v46 }
 0x10a   :  { %473 = vst [vmem:[#allocation2] sm:$0xff] %v472_v25   ;;  %v616_v5 = vpop.eup %615  ;;  %627 = vrcp.f32 %v285_v26 }
 0x10b   :  { %512 = vst [vmem:[#allocation2 + $0x20] sm:$0xff] %v492_v16   ;;  %v618_v19 = vpop.eup %617  ;;  %v312_v20 = vmul.f32 %v616_v5, %v772_v56 }
 0x10c   :  { %v620_v6 = vpop.eup %619  ;;  %v288_v32 = vadd.f32 1.0, %v618_v19 }
 0x10d   :  { %v622_v7 = vpop.eup %621  ;;  %v487_v8 = vpack.c.bf16 %v312_v20, %v311_v31  ;;  %v278_v9 = vadd.f32 1.0, %v620_v6 }
 0x10e   :  { %629 = vrcp.f32 %v288_v32  ;;  %v286_v10 = vadd.f32 1.0, %v622_v7  ;;  %v624_v11 = vpop.eup %623 }
 0x10f   :  { %511 = vst [vmem:[#allocation2 + $0x18] sm:$0xff] %v487_v8   ;;  %631 = vrcp.f32 %v278_v9  ;;  %v626_v14 = vpop.eup %625  ;;  %v319_v22 = vmul.f32 %v624_v11, %v764_v47 }
 0x110   :  { %633 = vrcp.f32 %v286_v10  ;;  %v309_v27 = vmul.f32 %v626_v14, %v767_v51 }
 0x114   :  { %v628_v17 = vpop.eup %627 }
 0x115   :  { %v317_v29 = vmul.f32 %v628_v17, %v777_v1 }
 0x118   :  { %v630_v21 = vpop.eup %629 }
 0x119   :  { %v632_v46 = vpop.eup %631  ;;  %v320_v56 = vmul.f32 %v630_v21, %v781_v13 }
 0x11a   :  { %v634_v24 = vpop.eup %633  ;;  %v310_v28 = vmul.f32 %v632_v46, %v784_v18 }
 0x11b   :  { %v507_v30 = vpack.c.bf16 %v320_v56, %v319_v22  ;;  %v318_v33 = vmul.f32 %v634_v24, %v787_v23 }
 0x11c   :  { %v482_v34 = vpack.c.bf16 %v310_v28, %v309_v27 }
 0x11d   :  { %515 = vst [vmem:[#allocation2 + $0x38] sm:$0xff] %v507_v30   ;;  %v502_v35 = vpack.c.bf16 %v318_v33, %v317_v29 }
 0x11e   :  { %510 = vst [vmem:[#allocation2 + $0x10] sm:$0xff] %v482_v34  }
 0x11f   :  { %514 = vst [vmem:[#allocation2 + $0x30] sm:$0xff] %v502_v35  }
 0x120   :  { %646 = shalt.err (!%p643_p4)
}
 0x121   :  { %s647_s11 = scalar_lea.hbm %s823_s3, 1024 }
 0x122   :  { %p648_p5 = scmp.ne.s32.totalorder %s823_s3, %s647_s11  ;;  %p651_p6 = scmp.lt.u32.totalorder %s647_s11, %s823_s3 }
 0x124   :  { %p653_p7 = pnand %p651_p6, %p648_p5 }
 0x126   :  { %656 = shalt.err (!%p653_p7)
}
 0x127   :  { %s660_s16 = smov 64   ;;  %s661_s17 = smov 4  }
 0x128   :  { %412 = dma.vmem_to_hbm [thread:$0]  %s407_s2, 1024, %s823_s3, [#allocation3], %s660_s16, %s660_s16, %s661_s17  }
 0x129   :  { %657 = dma.done.wait [#allocation3], 1024  }
 0x12a   :  { %658 = vsyncadd [#allocation3], 4294966272 }
 0x12b   :  { %416 = vsyncpa [#allocation3], 1 }

</bundles_post_ra>
